<compile_context>
chip_gen: v5e
topology: v5e:2x2
jax: 0.10.0
libtpu: 0.0.40
codegen_flags: <defaults>
</compile_context>

<pallas_src>
import jax
import jax.numpy as jnp
from jax.experimental import pallas as pl
from jax.experimental.pallas import tpu as pltpu


_LANES = 512                           # row width: multiple of 128 (and of 4)
_TARGET_BLOCK_BYTES = 2 * 1024 * 1024  # ~2 MB blocks -> near HBM roofline


def _round_up(x, m):
    return (x + m - 1) // m * m


def _clip_boxes_kernel(x_ref, lo_ref, hi_ref, o_ref):
    # x_ref / o_ref: (TB, C).  lo_ref / hi_ref: (1, C) per-lane clamp bounds
    # (the (x1, y1, x2, y2) pattern repeats every 4 lanes since 4 | C).
    o_ref[...] = jnp.minimum(jnp.maximum(x_ref[...], lo_ref[...]), hi_ref[...])


def clip_boxes(boxes, img):
    """Pallas equivalent of ClipBoxes.forward(boxes, img)."""
    B, N, four = boxes.shape
    assert four == 4, boxes.shape
    _, _, height, width = img.shape  # only the static shape is used
    dtype = boxes.dtype
    itemsize = jnp.dtype(dtype).itemsize

    C = _LANES
    E = B * N * 4
    R = _round_up(pl.cdiv(E, C), 8)  # rows, sublane-aligned (pad < one 8xC slab)

    # Row block: aim for ~_TARGET_BLOCK_BYTES per block, multiple of 8 rows.
    target_rows = max(8, (_TARGET_BLOCK_BYTES // (C * itemsize)) // 8 * 8)
    if R <= target_rows:
        # Small input: split into 2 blocks when possible so v7x's two
        # TensorCores both get work; otherwise one full block.
        TB = _round_up(pl.cdiv(R, 2), 8) if R >= 16 else R
    else:
        TB = target_rows
    grid = (pl.cdiv(R, TB),)  # partial last block is masked on writeback

    # Per-lane clamp bounds in the boxes' native dtype (no f32 promotion).
    lo = jnp.tile(
        jnp.array([0.0, 0.0, -jnp.inf, -jnp.inf], dtype), C // 4
    ).reshape(1, C)
    hi = jnp.tile(
        jnp.array([jnp.inf, jnp.inf, float(width), float(height)], dtype), C // 4
    ).reshape(1, C)

    flat = boxes.reshape(-1)  # contiguous row-major: free re-view
    pad = R * C - E
    if pad:
        flat = jnp.pad(flat, (0, pad))
    x2d = flat.reshape(R, C)

    out = pl.pallas_call(
        _clip_boxes_kernel,
        out_shape=jax.ShapeDtypeStruct((R, C), dtype),
        grid_spec=pltpu.PrefetchScalarGridSpec(
            num_scalar_prefetch=0,
            grid=grid,
            in_specs=[
                pl.BlockSpec((TB, C), lambda i: (i, 0)),   # boxes tile
                pl.BlockSpec((1, C), lambda i: (0, 0)),    # lo bounds (fetched once)
                pl.BlockSpec((1, C), lambda i: (0, 0)),    # hi bounds (fetched once)
            ],
            out_specs=pl.BlockSpec((TB, C), lambda i: (i, 0)),
        ),
        compiler_params=pltpu.CompilerParams(
            dimension_semantics=("parallel",),
            vmem_limit_bytes=32 * 1024 * 1024,
        ),
        input_output_aliases={0: 0},  # in-place clamp, like the PyTorch module
    )(x2d, lo, hi)

    return out.reshape(-1)[:E].reshape(B, N, 4)


def _reference_clip_boxes(boxes, img):
    """Pure-JAX reference for correctness checking."""
    _, _, height, width = img.shape
    x1 = jnp.maximum(boxes[:, :, 0], 0.0)
    y1 = jnp.maximum(boxes[:, :, 1], 0.0)
    x2 = jnp.minimum(boxes[:, :, 2], float(width))
    y2 = jnp.minimum(boxes[:, :, 3], float(height))
    return jnp.stack([x1, y1, x2, y2], axis=-1)


if __name__ == "__main__":
    # Small, module-consistent shapes.
    B, Cc, H, W = 2, 4, 16, 16
    N = 64  # anchors/boxes per image

    key = jax.random.PRNGKey(0)
    kb, ki = jax.random.split(key)
    # Coordinates spread around [-8, 24] so both the min and max clamps fire.
    boxes = jax.random.uniform(kb, (B, N, 4), jnp.float32, -8.0, 24.0)
    img = jax.random.normal(ki, (B, Cc, H, W), dtype=jnp.float32)  # NCHW like PyTorch

    out = jax.block_until_ready(jax.jit(clip_boxes)(boxes, img))
    assert out.shape == (B, N, 4), out.shape

    ref = jax.block_until_ready(_reference_clip_boxes(boxes, img))
    assert jnp.allclose(out, ref, atol=1e-6, rtol=0.0), float(
        jnp.max(jnp.abs(out - ref))
    )

    print("KERNEL_OK")
</pallas_src>

<mosaic_0001>
module attributes {stable_mosaic.version = 11 : i64} {
  func.func @_clip_boxes_kernel(%arg0: i32, %arg1: memref<8x512xf32, #tpu.memory_space<vmem>>, %arg2: memref<1x512xf32, #tpu.memory_space<vmem>>, %arg3: memref<1x512xf32, #tpu.memory_space<vmem>>, %arg4: memref<8x512xf32, #tpu.memory_space<vmem>>) attributes {dimension_semantics = [#tpu.dimension_semantics<parallel>], iteration_bounds = array<i64: 1>, scalar_prefetch = 0 : i64, scratch_operands = 0 : i64, tpu.core_type = #tpu.core_type<tc>, window_params = [{transform_indices = @transform_0, window_bounds = array<i64: 8, 512>}, {pipeline_mode = #tpu.pipeline_mode<synchronous>, transform_indices = @transform_1, window_bounds = array<i64: 1, 512>}, {pipeline_mode = #tpu.pipeline_mode<synchronous>, transform_indices = @transform_2, window_bounds = array<i64: 1, 512>}, {transform_indices = @transform_3, window_bounds = array<i64: 8, 512>}]} {
    %c0 = arith.constant 0 : index
    %c0_0 = arith.constant 0 : index
    %0 = vector.load %arg1[%c0, %c0_0] : memref<8x512xf32, #tpu.memory_space<vmem>>, vector<8x512xf32>
    %c0_1 = arith.constant 0 : index
    %c0_2 = arith.constant 0 : index
    %1 = vector.load %arg2[%c0_1, %c0_2] : memref<1x512xf32, #tpu.memory_space<vmem>>, vector<1x512xf32>
    %2 = vector.broadcast %1 : vector<1x512xf32> to vector<8x512xf32>
    %3 = arith.maximumf %0, %2 : vector<8x512xf32>
    %c0_3 = arith.constant 0 : index
    %c0_4 = arith.constant 0 : index
    %4 = vector.load %arg3[%c0_3, %c0_4] : memref<1x512xf32, #tpu.memory_space<vmem>>, vector<1x512xf32>
    %5 = vector.broadcast %4 : vector<1x512xf32> to vector<8x512xf32>
    %6 = arith.minimumf %3, %5 : vector<8x512xf32>
    %c0_5 = arith.constant 0 : index
    %c0_6 = arith.constant 0 : index
    %7 = vector.load %arg4[%c0_5, %c0_6] : memref<8x512xf32, #tpu.memory_space<vmem>>, vector<8x512xf32>
    tpu.vector_store %arg4[%c0_5, %c0_6], %6 {strides = array<i32>} : memref<8x512xf32, #tpu.memory_space<vmem>>, vector<8x512xf32>,
    return
  }
  func.func @transform_0(%arg0: i32) -> (i32, i32) {
    %c0_i32 = arith.constant 0 : i32
    %c0_i32_0 = arith.constant 0 : i32
    return %arg0, %c0_i32 : i32, i32
  }
  func.func @transform_1(%arg0: i32) -> (i32, i32) {
    %c0_i32 = arith.constant 0 : i32
    %c0_i32_0 = arith.constant 0 : i32
    %c0_i32_1 = arith.constant 0 : i32
    return %c0_i32, %c0_i32_0 : i32, i32
  }
  func.func @transform_2(%arg0: i32) -> (i32, i32) {
    %c0_i32 = arith.constant 0 : i32
    %c0_i32_0 = arith.constant 0 : i32
    %c0_i32_1 = arith.constant 0 : i32
    return %c0_i32, %c0_i32_0 : i32, i32
  }
  func.func @transform_3(%arg0: i32) -> (i32, i32) {
    %c0_i32 = arith.constant 0 : i32
    %c0_i32_0 = arith.constant 0 : i32
    return %arg0, %c0_i32 : i32, i32
  }
}

</mosaic_0001>

<bundles_post_ra>
// kernel: tile.10
= control target key start
LH: loop header
LB: loop body
LE: loop exit
PB: predicated region body
PF: predicated region fallthrough
CT: control target
= control target key end

     0   :  { %s112_s0 = inlined_call_operand.vmem [shape: f32[4], index: 0, kind: input, shape index: {}]   ;;  %s113_s1 = inlined_call_operand.vmem [shape: f32[128,4], index: 1, kind: output, shape index: {}]  }
   0x1   :  { %v4_v0 = vld [vmem:[%s112_s0] ss:$0 sm:$0xff] }
   0x2   :  { %5 = vst [vmem:[%s113_s1] sm:$0xff] %v4_v0 }
   0x3   :  { %36 = vst [vmem:[%s113_s1 + $0x8] sm:$0xff] %v4_v0 }
   0x4   :  { %37 = vst [vmem:[%s113_s1 + $0x10] sm:$0xff] %v4_v0 }
   0x5   :  { %38 = vst [vmem:[%s113_s1 + $0x18] sm:$0xff] %v4_v0 }
   0x6   :  { %39 = vst [vmem:[%s113_s1 + $0x20] sm:$0xff] %v4_v0 }
   0x7   :  { %40 = vst [vmem:[%s113_s1 + $0x28] sm:$0xff] %v4_v0 }
   0x8   :  { %41 = vst [vmem:[%s113_s1 + $0x30] sm:$0xff] %v4_v0 }
   0x9   :  { %42 = vst [vmem:[%s113_s1 + $0x38] sm:$0xff] %v4_v0 }
   0xa   :  { %43 = vst [vmem:[%s113_s1 + $0x40] sm:$0xff] %v4_v0 }
   0xb   :  { %44 = vst [vmem:[%s113_s1 + $0x48] sm:$0xff] %v4_v0 }
   0xc   :  { %45 = vst [vmem:[%s113_s1 + $0x50] sm:$0xff] %v4_v0 }
   0xd   :  { %46 = vst [vmem:[%s113_s1 + $0x58] sm:$0xff] %v4_v0 }
   0xe   :  { %47 = vst [vmem:[%s113_s1 + $0x60] sm:$0xff] %v4_v0 }
   0xf   :  { %48 = vst [vmem:[%s113_s1 + $0x68] sm:$0xff] %v4_v0 }
  0x10   :  { %49 = vst [vmem:[%s113_s1 + $0x70] sm:$0xff] %v4_v0 }
  0x11   :  { %50 = vst [vmem:[%s113_s1 + $0x78] sm:$0xff] %v4_v0 }

// kernel: tile.11
= control target key start
LH: loop header
LB: loop body
LE: loop exit
PB: predicated region body
PF: predicated region fallthrough
CT: control target
= control target key end

     0   :  { %vm5_vm0 = vcmask 1041409   ;;  %vm9_vm1 = vcmask 1042434   ;;  %vm13_vm2 = vcmask 1043459   ;;  %s760_s28 = smov 124   ;;  %s761_s6 = smov 116   ;;  %vm15_vm3 = vcmask 31744   ;;  %s1293_s0 = inlined_call_operand.vmem [shape: f32[128,4], index: 0, kind: input, shape index: {}]   ;;  %s1294_s1 = inlined_call_operand.vmem [shape: f32[1,512], index: 1, kind: output, shape index: {}]  }
   0x1   :  { %v602_v0 = vld [vmem:[%s1293_s0 + $0x1f] sm:$0x1]   ;;  %v610_v5 = vld [vmem:[%s1293_s0 + $0x1d] sm:$0x1]   ;;  %v606_v11 = vld [vmem:[%s1293_s0 + $0x1e] sm:$0x1]  }
   0x2   :  { %v603_v1 = vld [vmem:[%s1293_s0 + $0x3e] sm:$0x2]   ;;  %v611_v6 = vld [vmem:[%s1293_s0 + $0x3c] sm:$0x2]   ;;  %v607_v14 = vld [vmem:[%s1293_s0 + $0x3d] sm:$0x2]  }
   0x3   :  { %v604_v2 = vld [vmem:[%s1293_s0 + $0x5d] sm:$0x4]   ;;  %v22_v4 = vsel %vm5_vm0, %v603_v1, %v602_v0  ;;  %v612_v7 = vld [vmem:[%s1293_s0 + $0x5b] sm:$0x4]   ;;  %v58_v9 = vsel %vm5_vm0, %v611_v6, %v610_v5  ;;  %v608_v15 = vld [vmem:[%s1293_s0 + $0x5c] sm:$0x4]   ;;  %v40_v17 = vsel %vm5_vm0, %v607_v14, %v606_v11 }
   0x4   :  { %v605_v3 = vld [vmem:[%s1293_s0 + $0x7c] sm:$0x8]   ;;  %v26_v8 = vsel %vm9_vm1, %v604_v2, %v22_v4  ;;  %v613_v10 = vld [vmem:[%s1293_s0 + $0x7a] sm:$0x8]   ;;  %v62_v13 = vsel %vm9_vm1, %v612_v7, %v58_v9  ;;  %v614_v18 = vld [vmem:[%s1293_s0 + $0x1c] sm:$0x1]   ;;  %v44_v22 = vsel %vm9_vm1, %v608_v15, %v40_v17 }
   0x5   :  { %v30_v12 = vsel %vm13_vm2, %v605_v3, %v26_v8  ;;  %v66_v16 = vsel %vm13_vm2, %v613_v10, %v62_v13  ;;  %v615_v19 = vld [vmem:[%s1293_s0 + $0x3b] sm:$0x2]   ;;  %v609_v23 = vld [vmem:[%s1293_s0 + $0x7b] sm:$0x8]   ;;  %v626_v26 = vld [vmem:[%s1293_s0 + $0x19] sm:$0x1]  }
   0x6   :  { %31 = vrot.lane.b32.xlu0 %v30_v12, %s760_s28  ;;  %v616_v20 = vld [vmem:[%s1293_s0 + $0x5a] sm:$0x4]   ;;  %67 = vrot.lane.b32.xlu1 %v66_v16, %s761_s6  ;;  %v76_v21 = vsel %vm5_vm0, %v615_v19, %v614_v18  ;;  %v627_v27 = vld [vmem:[%s1293_s0 + $0x38] sm:$0x2]   ;;  %v48_v28 = vsel %vm13_vm2, %v609_v23, %v44_v22  ;;  %s762_s25 = smov 120   ;;  %s763_s3 = smov 112  }
   0x7   :  { %v80_v24 = vsel %vm9_vm1, %v616_v20, %v76_v21  ;;  %v617_v25 = vld [vmem:[%s1293_s0 + $0x79] sm:$0x8]   ;;  %v630_v29 = vld [vmem:[%s1293_s0 + $0x18] sm:$0x1]   ;;  %v130_v32 = vsel %vm5_vm0, %v627_v27, %v626_v26  ;;  %v628_v33 = vld [vmem:[%s1293_s0 + $0x57] sm:$0x4]  }
   0x8   :  { %v631_v30 = vld [vmem:[%s1293_s0 + $0x37] sm:$0x2]   ;;  %v84_v31 = vsel %vm13_vm2, %v617_v25, %v80_v24  ;;  %v618_v35 = vld [vmem:[%s1293_s0 + $0x1b] sm:$0x1]   ;;  %v134_v41 = vsel %vm9_vm1, %v628_v33, %v130_v32  ;;  %v629_v42 = vld [vmem:[%s1293_s0 + $0x76] sm:$0x8]  }
   0x9   :  { %v632_v34 = vld [vmem:[%s1293_s0 + $0x56] sm:$0x4]   ;;  %v148_v36 = vsel %vm5_vm0, %v631_v30, %v630_v29  ;;  %v619_v37 = vld [vmem:[%s1293_s0 + $0x3a] sm:$0x2]   ;;  %v638_v46 = vld [vmem:[%s1293_s0 + $0x16] sm:$0x1]   ;;  %v138_v52 = vsel %vm13_vm2, %v629_v42, %v134_v41 }
   0xa   :  { %v620_v38 = vld [vmem:[%s1293_s0 + $0x59] sm:$0x4]   ;;  %v94_v40 = vsel %vm5_vm0, %v619_v37, %v618_v35  ;;  %v152_v44 = vsel %vm9_vm1, %v632_v34, %v148_v36  ;;  %v633_v45 = vld [vmem:[%s1293_s0 + $0x75] sm:$0x8]   ;;  %v639_v47 = vld [vmem:[%s1293_s0 + $0x35] sm:$0x2]  }
   0xb   :  { %v621_v39 = vld [vmem:[%s1293_s0 + $0x78] sm:$0x8]   ;;  %v98_v43 = vsel %vm9_vm1, %v620_v38, %v94_v40  ;;  %s764_s12 = smov 108   ;;  %v622_v49 = vld [vmem:[%s1293_s0 + $0x1a] sm:$0x1]   ;;  %v156_v56 = vsel %vm13_vm2, %v633_v45, %v152_v44  ;;  %v184_v59 = vsel %vm5_vm0, %v639_v47, %v638_v46  ;;  %s765_s27 = smov 100  }
   0xc   :  { %v102_v48 = vsel %vm13_vm2, %v621_v39, %v98_v43  ;;  %v623_v50 = vld [vmem:[%s1293_s0 + $0x39] sm:$0x2]   ;;  %v642_v53 = vld [vmem:[%s1293_s0 + $0x15] sm:$0x1]   ;;  %v640_v60 = vld [vmem:[%s1293_s0 + $0x54] sm:$0x4]  }
   0xd   :  { %103 = vrot.lane.b32.xlu2 %v102_v48, %s764_s12  ;;  %v624_v51 = vld [vmem:[%s1293_s0 + $0x58] sm:$0x4]   ;;  %v643_v54 = vld [vmem:[%s1293_s0 + $0x34] sm:$0x2]   ;;  %v112_v55 = vsel %vm5_vm0, %v623_v50, %v622_v49  ;;  %v634_v63 = vld [vmem:[%s1293_s0 + $0x17] sm:$0x1]   ;;  %v188_v2 = vsel %vm9_vm1, %v640_v60, %v184_v59 }
   0xe   :  { %49 = vrot.lane.b32.xlu0 %v48_v28, %s762_s25  ;;  %85 = vrot.lane.b32.xlu1 %v84_v31, %s763_s3  ;;  %v116_v57 = vsel %vm9_vm1, %v624_v51, %v112_v55  ;;  %v625_v58 = vld [vmem:[%s1293_s0 + $0x77] sm:$0x8]   ;;  %v202_v61 = vsel %vm5_vm0, %v643_v54, %v642_v53  ;;  %v644_v62 = vld [vmem:[%s1293_s0 + $0x53] sm:$0x4]   ;;  %s766_s3 = smov 96   ;;  %s767_s16 = smov 104  }
   0xf   :  { %v120_v0 = vsel %vm13_vm2, %v625_v58, %v116_v57  ;;  %v635_v1 = vld [vmem:[%s1293_s0 + $0x36] sm:$0x2]   ;;  %v641_v3 = vld [vmem:[%s1293_s0 + $0x73] sm:$0x8]   ;;  %v206_v4 = vsel %vm9_vm1, %v644_v62, %v202_v61  ;;  %v645_v5 = vld [vmem:[%s1293_s0 + $0x72] sm:$0x8]  }
  0x10   :  { %v166_v6 = vsel %vm5_vm0, %v635_v1, %v634_v63  ;;  %v636_v7 = vld [vmem:[%s1293_s0 + $0x55] sm:$0x4]   ;;  %v650_v8 = vld [vmem:[%s1293_s0 + $0x13] sm:$0x1]   ;;  %v192_v10 = vsel %vm13_vm2, %v641_v3, %v188_v2  ;;  %v654_v11 = vld [vmem:[%s1293_s0 + $0x12] sm:$0x1]   ;;  %v210_v13 = vsel %vm13_vm2, %v645_v5, %v206_v4 }
  0x11   :  { %v651_v9 = vld [vmem:[%s1293_s0 + $0x32] sm:$0x2]   ;;  %v655_v12 = vld [vmem:[%s1293_s0 + $0x31] sm:$0x2]   ;;  %v170_v14 = vsel %vm9_vm1, %v636_v7, %v166_v6  ;;  %v637_v15 = vld [vmem:[%s1293_s0 + $0x74] sm:$0x8]  }
  0x12   :  { %v238_v16 = vsel %vm5_vm0, %v651_v9, %v650_v8  ;;  %v652_v17 = vld [vmem:[%s1293_s0 + $0x51] sm:$0x4]   ;;  %s768_s25 = smov 88   ;;  %v256_v18 = vsel %vm5_vm0, %v655_v12, %v654_v11  ;;  %v656_v19 = vld [vmem:[%s1293_s0 + $0x50] sm:$0x4]   ;;  %v174_v22 = vsel %vm13_vm2, %v637_v15, %v170_v14  ;;  %s770_s14 = smov 92  }
  0x13   :  { %v646_v20 = vld [vmem:[%s1293_s0 + $0x14] sm:$0x1]   ;;  %v242_v23 = vsel %vm9_vm1, %v652_v17, %v238_v16  ;;  %v653_v24 = vld [vmem:[%s1293_s0 + $0x70] sm:$0x8]   ;;  %v260_v25 = vsel %vm9_vm1, %v656_v19, %v256_v18  ;;  %v657_v26 = vld [vmem:[%s1293_s0 + $0x6f] sm:$0x8]  }
  0x14   :  { %v647_v21 = vld [vmem:[%s1293_s0 + $0x33] sm:$0x2]   ;;  %v662_v29 = vld [vmem:[%s1293_s0 + $0x10] sm:$0x1]   ;;  %v246_v31 = vsel %vm13_vm2, %v653_v24, %v242_v23  ;;  %v666_v32 = vld [vmem:[%s1293_s0 + $0xf] sm:$0x1]   ;;  %v264_v34 = vsel %vm13_vm2, %v657_v26, %v260_v25 }
  0x15   :  { %121 = vrot.lane.b32.xlu2 %v120_v0, %s767_s16  ;;  %v220_v27 = vsel %vm5_vm0, %v647_v21, %v646_v20  ;;  %v648_v28 = vld [vmem:[%s1293_s0 + $0x52] sm:$0x4]   ;;  %v663_v30 = vld [vmem:[%s1293_s0 + $0x2f] sm:$0x2]   ;;  %v667_v33 = vld [vmem:[%s1293_s0 + $0x2e] sm:$0x2]  }
  0x16   :  { %139 = vrot.lane.b32.xlu0 %v138_v52, %s765_s27  ;;  %157 = vrot.lane.b32.xlu1 %v156_v56, %s766_s3  ;;  %s769_s3 = smov 84   ;;  %v224_v35 = vsel %vm9_vm1, %v648_v28, %v220_v27  ;;  %v649_v36 = vld [vmem:[%s1293_s0 + $0x71] sm:$0x8]   ;;  %v292_v37 = vsel %vm5_vm0, %v663_v30, %v662_v29  ;;  %v664_v38 = vld [vmem:[%s1293_s0 + $0x4e] sm:$0x4]   ;;  %s771_s23 = smov 76   ;;  %v310_v39 = vsel %vm5_vm0, %v667_v33, %v666_v32 }
  0x17   :  { %v668_v40 = vld [vmem:[%s1293_s0 + $0x4d] sm:$0x4]   ;;  %v658_v41 = vld [vmem:[%s1293_s0 + $0x11] sm:$0x1]   ;;  %s772_s30 = smov 72   ;;  %v228_v43 = vsel %vm13_vm2, %v649_v36, %v224_v35  ;;  %v296_v44 = vsel %vm9_vm1, %v664_v38, %v292_v37  ;;  %s773_s12 = smov 80  }
  0x18   :  { %v659_v42 = vld [vmem:[%s1293_s0 + $0x30] sm:$0x2]   ;;  %v665_v45 = vld [vmem:[%s1293_s0 + $0x6d] sm:$0x8]   ;;  %v314_v46 = vsel %vm9_vm1, %v668_v40, %v310_v39  ;;  %v669_v47 = vld [vmem:[%s1293_s0 + $0x6c] sm:$0x8]  }
  0x19   :  { %v274_v48 = vsel %vm5_vm0, %v659_v42, %v658_v41  ;;  %v660_v49 = vld [vmem:[%s1293_s0 + $0x4f] sm:$0x4]   ;;  %v674_v50 = vld [vmem:[%s1293_s0 + $0xd] sm:$0x1]   ;;  %v300_v52 = vsel %vm13_vm2, %v665_v45, %v296_v44  ;;  %v678_v53 = vld [vmem:[%s1293_s0 + $0xc] sm:$0x1]   ;;  %v318_v55 = vsel %vm13_vm2, %v669_v47, %v314_v46 }
  0x1a   :  { %v675_v51 = vld [vmem:[%s1293_s0 + $0x2c] sm:$0x2]   ;;  %v679_v54 = vld [vmem:[%s1293_s0 + $0x2b] sm:$0x2]   ;;  %v278_v56 = vsel %vm9_vm1, %v660_v49, %v274_v48  ;;  %v661_v57 = vld [vmem:[%s1293_s0 + $0x6e] sm:$0x8]  }
  0x1b   :  { %v346_v58 = vsel %vm5_vm0, %v675_v51, %v674_v50  ;;  %v676_v59 = vld [vmem:[%s1293_s0 + $0x4b] sm:$0x4]   ;;  %s774_s21 = smov 64   ;;  %v364_v60 = vsel %vm5_vm0, %v679_v54, %v678_v53  ;;  %v680_v61 = vld [vmem:[%s1293_s0 + $0x4a] sm:$0x4]   ;;  %s775_s28 = smov 60   ;;  %v282_v0 = vsel %vm13_vm2, %v661_v57, %v278_v56 }
  0x1c   :  { %v670_v62 = vld [vmem:[%s1293_s0 + $0xe] sm:$0x1]   ;;  %v350_v1 = vsel %vm9_vm1, %v676_v59, %v346_v58  ;;  %v677_v2 = vld [vmem:[%s1293_s0 + $0x6a] sm:$0x8]   ;;  %v368_v3 = vsel %vm9_vm1, %v680_v61, %v364_v60  ;;  %v681_v4 = vld [vmem:[%s1293_s0 + $0x69] sm:$0x8]  }
  0x1d   :  { %175 = vrot.lane.b32.xlu2 %v174_v22, %s770_s14  ;;  %v671_v63 = vld [vmem:[%s1293_s0 + $0x2d] sm:$0x2]   ;;  %v686_v7 = vld [vmem:[%s1293_s0 + $0xa] sm:$0x1]   ;;  %s776_s10 = smov 68   ;;  %v354_v9 = vsel %vm13_vm2, %v677_v2, %v350_v1  ;;  %v372_v12 = vsel %vm13_vm2, %v681_v4, %v368_v3  ;;  %s777_s19 = smov 52  }
  0x1e   :  { %193 = vrot.lane.b32.xlu0 %v192_v10, %s768_s25  ;;  %211 = vrot.lane.b32.xlu1 %v210_v13, %s769_s3  ;;  %v328_v5 = vsel %vm5_vm0, %v671_v63, %v670_v62  ;;  %v672_v6 = vld [vmem:[%s1293_s0 + $0x4c] sm:$0x4]   ;;  %v687_v8 = vld [vmem:[%s1293_s0 + $0x29] sm:$0x2]   ;;  %s778_s26 = smov 48   ;;  %s779_s8 = smov 56  }
  0x1f   :  { %v690_v10 = vld [vmem:[%s1293_s0 + $0x9] sm:$0x1]   ;;  %v332_v13 = vsel %vm9_vm1, %v672_v6, %v328_v5  ;;  %v673_v14 = vld [vmem:[%s1293_s0 + $0x6b] sm:$0x8]   ;;  %v400_v15 = vsel %vm5_vm0, %v687_v8, %v686_v7  ;;  %v688_v16 = vld [vmem:[%s1293_s0 + $0x48] sm:$0x4]  }
  0x20   :  { %v691_v11 = vld [vmem:[%s1293_s0 + $0x28] sm:$0x2]   ;;  %v682_v19 = vld [vmem:[%s1293_s0 + $0xb] sm:$0x1]   ;;  %v336_v21 = vsel %vm13_vm2, %v673_v14, %v332_v13  ;;  %v404_v22 = vsel %vm9_vm1, %v688_v16, %v400_v15  ;;  %v689_v23 = vld [vmem:[%s1293_s0 + $0x67] sm:$0x8]  }
  0x21   :  { %v418_v17 = vsel %vm5_vm0, %v691_v11, %v690_v10  ;;  %v692_v18 = vld [vmem:[%s1293_s0 + $0x47] sm:$0x4]   ;;  %v683_v20 = vld [vmem:[%s1293_s0 + $0x2a] sm:$0x2]   ;;  %v698_v28 = vld [vmem:[%s1293_s0 + $0x7] sm:$0x1]   ;;  %v408_v30 = vsel %vm13_vm2, %v689_v23, %v404_v22 }
  0x22   :  { %v422_v24 = vsel %vm9_vm1, %v692_v18, %v418_v17  ;;  %v693_v25 = vld [vmem:[%s1293_s0 + $0x66] sm:$0x8]   ;;  %v382_v26 = vsel %vm5_vm0, %v683_v20, %v682_v19  ;;  %v684_v27 = vld [vmem:[%s1293_s0 + $0x49] sm:$0x4]   ;;  %v699_v29 = vld [vmem:[%s1293_s0 + $0x26] sm:$0x2]  }
  0x23   :  { %v703_v32 = vld [vmem:[%s1293_s0 + $0x25] sm:$0x2]   ;;  %v426_v33 = vsel %vm13_vm2, %v693_v25, %v422_v24  ;;  %v685_v35 = vld [vmem:[%s1293_s0 + $0x68] sm:$0x8]   ;;  %v454_v36 = vsel %vm5_vm0, %v699_v29, %v698_v28  ;;  %v700_v37 = vld [vmem:[%s1293_s0 + $0x45] sm:$0x4]  }
  0x24   :  { %s780_s17 = smov 40   ;;  %v704_v39 = vld [vmem:[%s1293_s0 + $0x44] sm:$0x4]   ;;  %v694_v40 = vld [vmem:[%s1293_s0 + $0x8] sm:$0x1]   ;;  %s781_s24 = smov 36  }
  0x25   :  { %229 = vrot.lane.b32.xlu2 %v228_v43, %s773_s12  ;;  %v695_v41 = vld [vmem:[%s1293_s0 + $0x27] sm:$0x2]   ;;  %v458_v43 = vsel %vm9_vm1, %v700_v37, %v454_v36  ;;  %v701_v44 = vld [vmem:[%s1293_s0 + $0x64] sm:$0x8]   ;;  %v705_v46 = vld [vmem:[%s1293_s0 + $0x63] sm:$0x8]  }
  0x26   :  { %247 = vrot.lane.b32.xlu0 %v246_v31, %s771_s23  ;;  %265 = vrot.lane.b32.xlu1 %v264_v34, %s772_s30  ;;  %v702_v31 = vld [vmem:[%s1293_s0 + $0x6] sm:$0x1]   ;;  %v386_v34 = vsel %vm9_vm1, %v684_v27, %v382_v26  ;;  %v436_v47 = vsel %vm5_vm0, %v695_v41, %v694_v40  ;;  %v696_v48 = vld [vmem:[%s1293_s0 + $0x46] sm:$0x4]   ;;  %s782_s6 = smov 44   ;;  %v462_v51 = vsel %vm13_vm2, %v701_v44, %v458_v43  ;;  %s783_s15 = smov 28  }
  0x27   :  { %v472_v38 = vsel %vm5_vm0, %v703_v32, %v702_v31  ;;  %v390_v42 = vsel %vm13_vm2, %v685_v35, %v386_v34  ;;  %v710_v49 = vld [vmem:[%s1293_s0 + $0x4] sm:$0x1]   ;;  %v715_v53 = vld [vmem:[%s1293_s0 + $0x22] sm:$0x2]   ;;  %v697_v56 = vld [vmem:[%s1293_s0 + $0x65] sm:$0x8]  }
  0x28   :  { %v476_v45 = vsel %vm9_vm1, %v704_v39, %v472_v38  ;;  %v711_v50 = vld [vmem:[%s1293_s0 + $0x23] sm:$0x2]   ;;  %v716_v60 = vld [vmem:[%s1293_s0 + $0x41] sm:$0x4]   ;;  %v706_v61 = vld [vmem:[%s1293_s0 + $0x5] sm:$0x1]  }
  0x29   :  { %v480_v54 = vsel %vm13_vm2, %v705_v46, %v476_v45  ;;  %v508_v57 = vsel %vm5_vm0, %v711_v50, %v710_v49  ;;  %v712_v58 = vld [vmem:[%s1293_s0 + $0x42] sm:$0x4]   ;;  %v707_v62 = vld [vmem:[%s1293_s0 + $0x24] sm:$0x2]   ;;  %s784_s22 = smov 24   ;;  %s785_s4 = smov 32  }
  0x2a   :  { %v713_v1 = vld [vmem:[%s1293_s0 + $0x61] sm:$0x8]   ;;  %v717_v3 = vld [vmem:[%s1293_s0 + $0x60] sm:$0x8]   ;;  %v490_v4 = vsel %vm5_vm0, %v707_v62, %v706_v61  ;;  %v708_v5 = vld [vmem:[%s1293_s0 + $0x43] sm:$0x4]  }
  0x2b   :  { %v722_v6 = vld [vmem:[%s1293_s0 + $0x1] sm:$0x1]   ;;  %v494_v10 = vsel %vm9_vm1, %v708_v5, %v490_v4  ;;  %v709_v11 = vld [vmem:[%s1293_s0 + $0x62] sm:$0x8]   ;;  %s786_s9 = smov 16   ;;  %s787_s14 = smov 12  }
  0x2c   :  { %v723_v7 = vld [vmem:[%s1293_s0 + $0x20] sm:$0x2]   ;;  %v718_v14 = vld [vmem:[%s1293_s0 + $0x2] sm:$0x1]   ;;  %v498_v16 = vsel %vm13_vm2, %v709_v11, %v494_v10  ;;  %v600_v23 = vld [vmem:[%s1293_s0 + $0x3e] sm:$0x4]  }
  0x2d   :  { %283 = vrot.lane.b32.xlu2 %v282_v0, %s776_s10  ;;  %v512_v0 = vsel %vm9_vm1, %v712_v58, %v508_v57  ;;  %v724_v13 = vld [vmem:[%s1293_s0 + $0x3f] sm:$0x4]   ;;  %v719_v15 = vld [vmem:[%s1293_s0 + $0x21] sm:$0x2]   ;;  %v601_v25 = vld [vmem:[%s1293_s0 + $0x5d] sm:$0x8]  }
  0x2e   :  { %301 = vrot.lane.b32.xlu0 %v300_v52, %s774_s21  ;;  %319 = vrot.lane.b32.xlu1 %v318_v55, %s775_s28  ;;  %v714_v52 = vld [vmem:[%s1293_s0 + $0x3] sm:$0x1]   ;;  %v440_v55 = vsel %vm9_vm1, %v696_v48, %v436_v47  ;;  %v516_v8 = vsel %vm13_vm2, %v713_v1, %v512_v0  ;;  %v725_v18 = vld [vmem:[%s1293_s0 + $0x5e] sm:$0x8]   ;;  %v544_v19 = vsel %vm5_vm0, %v719_v15, %v718_v14  ;;  %s790_s30 = smov 8   ;;  %vm33_vm4 = vcmask 1048544  }
  0x2f   :  { %v526_v59 = vsel %vm5_vm0, %v715_v53, %v714_v52  ;;  %v444_v63 = vsel %vm13_vm2, %v697_v56, %v440_v55  ;;  %v720_v20 = vld [vmem:[%s1293_s0 + $0x40] sm:$0x4]   ;;  %v2_v26 = vld [vmem:[%s1293_s0] sm:$0x1]   ;;  %vm51_vm5 = vcmask 1015744   ;;  %vm69_vm6 = vcmask 982944  }
  0x30   :  { %v530_v2 = vsel %vm9_vm1, %v716_v60, %v526_v59  ;;  %v721_v22 = vld [vmem:[%s1293_s0 + $0x5f] sm:$0x8]   ;;  %v548_v24 = vsel %vm9_vm1, %v720_v20, %v544_v19  ;;  %v599_v27 = vld [vmem:[%s1293_s0 + $0x1f] sm:$0x2]   ;;  %s789_s0 = smov 4   ;;  %vm87_vm7 = vcmask 950144  }
  0x31   :  { %v6_v28 = vsel %vm5_vm0, %v599_v27, %v2_v26  ;;  %vm105_vm8 = vcmask 917344   ;;  %vm123_vm9 = vcmask 884544   ;;  %vm141_vm10 = vcmask 851744  }
  0x32   :  { %v10_v29 = vsel %vm9_vm1, %v600_v23, %v6_v28  ;;  %vm159_vm11 = vcmask 818944   ;;  %vm177_vm12 = vcmask 786144   ;;  %vm195_vm13 = vcmask 753344  }
  0x33   :  { %v14_v31 = vsel %vm13_vm2, %v601_v25, %v10_v29  ;;  %vm213_vm14 = vcmask 720544   ;;  %vm231_vm15 = vcmask 687744  }
  0x34   :  { %16 = vst.msk [vmem:[#allocation0] ss:$8 sm:$0xf] %vm15_vm3, %v14_v31   ;;  %vm303_vm3 = vcmask 556544  }
  0x35   :  { %337 = vrot.lane.b32.xlu2 %v336_v21, %s779_s8 }
  0x36   :  { %355 = vrot.lane.b32.xlu0 %v354_v9, %s777_s19  ;;  %373 = vrot.lane.b32.xlu1 %v372_v12, %s778_s26  ;;  %v534_v9 = vsel %vm13_vm2, %v717_v3, %v530_v2  ;;  %v562_v12 = vsel %vm5_vm0, %v723_v7, %v722_v6  ;;  %s788_s19 = smov 20   ;;  %vm249_vm0 = vcmask 654944  }
  0x37   :  { %v566_v17 = vsel %vm9_vm1, %v724_v13, %v562_v12  ;;  %vm267_vm1 = vcmask 622144  }
  0x38   :  { %v570_v21 = vsel %vm13_vm2, %v725_v18, %v566_v17 }
  0x3d   :  { %391 = vrot.lane.b32.xlu2 %v390_v42, %s782_s6 }
  0x3e   :  { %409 = vrot.lane.b32.xlu0 %v408_v30, %s780_s17  ;;  %427 = vrot.lane.b32.xlu1 %v426_v33, %s781_s24  ;;  %v552_v30 = vsel %vm13_vm2, %v721_v22, %v548_v24  ;;  %vm285_vm2 = vcmask 589344  }
  0x45   :  { %445 = vrot.lane.b32.xlu2 %v444_v63, %s785_s4 }
  0x46   :  { %463 = vrot.lane.b32.xlu0 %v462_v51, %s783_s15  ;;  %481 = vrot.lane.b32.xlu1 %v480_v54, %s784_s22 }
  0x4d   :  { %499 = vrot.lane.b32.xlu2 %v498_v16, %s788_s19 }
  0x4e   :  { %517 = vrot.lane.b32.xlu0 %v516_v8, %s786_s9  ;;  %535 = vrot.lane.b32.xlu1 %v534_v9, %s787_s14 }
  0x55   :  { %553 = vrot.lane.b32.xlu2 %v552_v30, %s790_s30 }
  0x56   :  { %571 = vrot.lane.b32.xlu0 %v570_v21, %s789_s0 }
  0x67   :  { %v104_v32 = vpop.permute.xlu2 %103  }
  0x6f   :  { %v122_v33 = vpop.permute.xlu2 %121  }
  0x77   :  { %v176_v36 = vpop.permute.xlu2 %175  }
  0x78   :  { %v32_v34 = vpop.permute.xlu0 %31   ;;  %v68_v35 = vpop.permute.xlu1 %67  }
  0x79   :  { %34 = vst.msk [vmem:[#allocation0] ss:$8 sm:$0xf] %vm33_vm4, %v32_v34   ;;  %vm321_vm4 = vcmask 523744  }
  0x7f   :  { %v230_v39 = vpop.permute.xlu2 %229  }
  0x80   :  { %v50_v37 = vpop.permute.xlu0 %49   ;;  %v86_v38 = vpop.permute.xlu1 %85  }
  0x81   :  { %52 = vst.msk [vmem:[#allocation0] ss:$8 sm:$0xf] %vm51_vm5, %v50_v37   ;;  %vm339_vm5 = vcmask 490944  }
  0x82   :  { %70 = vst.msk [vmem:[#allocation0] ss:$8 sm:$0xf] %vm69_vm6, %v68_v35   ;;  %vm357_vm6 = vcmask 458144  }
  0x83   :  { %88 = vst.msk [vmem:[#allocation0] ss:$8 sm:$0xf] %vm87_vm7, %v86_v38   ;;  %vm375_vm7 = vcmask 425344  }
  0x84   :  { %106 = vst.msk [vmem:[#allocation0] ss:$8 sm:$0xf] %vm105_vm8, %v104_v32   ;;  %vm393_vm8 = vcmask 392544  }
  0x85   :  { %124 = vst.msk [vmem:[#allocation0] ss:$8 sm:$0xf] %vm123_vm9, %v122_v33   ;;  %vm411_vm9 = vcmask 359744  }
  0x87   :  { %v284_v42 = vpop.permute.xlu2 %283  }
  0x88   :  { %v140_v40 = vpop.permute.xlu0 %139   ;;  %v158_v41 = vpop.permute.xlu1 %157  }
  0x89   :  { %142 = vst.msk [vmem:[#allocation0] ss:$8 sm:$0xf] %vm141_vm10, %v140_v40   ;;  %vm429_vm10 = vcmask 326944  }
  0x8a   :  { %160 = vst.msk [vmem:[#allocation0] ss:$8 sm:$0xf] %vm159_vm11, %v158_v41   ;;  %vm447_vm11 = vcmask 294144  }
  0x8b   :  { %178 = vst.msk [vmem:[#allocation0] ss:$8 sm:$0xf] %vm177_vm12, %v176_v36   ;;  %vm465_vm12 = vcmask 261344  }
  0x8f   :  { %v338_v45 = vpop.permute.xlu2 %337  }
  0x90   :  { %v194_v43 = vpop.permute.xlu0 %193   ;;  %v212_v44 = vpop.permute.xlu1 %211  }
  0x91   :  { %196 = vst.msk [vmem:[#allocation0] ss:$8 sm:$0xf] %vm195_vm13, %v194_v43   ;;  %vm483_vm13 = vcmask 228544  }
  0x92   :  { %214 = vst.msk [vmem:[#allocation0] ss:$8 sm:$0xf] %vm213_vm14, %v212_v44   ;;  %vm501_vm14 = vcmask 195744  }
  0x93   :  { %232 = vst.msk [vmem:[#allocation0] ss:$8 sm:$0xf] %vm231_vm15, %v230_v39   ;;  %vm519_vm15 = vcmask 162944  }
  0x97   :  { %v392_v48 = vpop.permute.xlu2 %391  }
  0x98   :  { %v248_v46 = vpop.permute.xlu0 %247   ;;  %v266_v47 = vpop.permute.xlu1 %265  }
  0x99   :  { %250 = vst.msk [vmem:[#allocation0] ss:$8 sm:$0xf] %vm249_vm0, %v248_v46   ;;  %vm537_vm0 = vcmask 130144  }
  0x9a   :  { %268 = vst.msk [vmem:[#allocation0] ss:$8 sm:$0xf] %vm267_vm1, %v266_v47   ;;  %vm555_vm1 = vcmask 97344  }
  0x9b   :  { %286 = vst.msk [vmem:[#allocation0] ss:$8 sm:$0xf] %vm285_vm2, %v284_v42   ;;  %vm573_vm2 = vcmask 64544  }
  0x9f   :  { %v446_v51 = vpop.permute.xlu2 %445  }
  0xa0   :  { %v302_v49 = vpop.permute.xlu0 %301   ;;  %v320_v50 = vpop.permute.xlu1 %319  }
  0xa1   :  { %304 = vst.msk [vmem:[#allocation0] ss:$8 sm:$0xf] %vm303_vm3, %v302_v49  }
  0xa2   :  { %322 = vst.msk [vmem:[#allocation0] ss:$8 sm:$0xf] %vm321_vm4, %v320_v50  }
  0xa3   :  { %340 = vst.msk [vmem:[#allocation0] ss:$8 sm:$0xf] %vm339_vm5, %v338_v45  }
  0xa7   :  { %v500_v54 = vpop.permute.xlu2 %499  }
  0xa8   :  { %v356_v52 = vpop.permute.xlu0 %355   ;;  %v374_v53 = vpop.permute.xlu1 %373  }
  0xa9   :  { %358 = vst.msk [vmem:[#allocation0] ss:$8 sm:$0xf] %vm357_vm6, %v356_v52  }
  0xaa   :  { %376 = vst.msk [vmem:[#allocation0] ss:$8 sm:$0xf] %vm375_vm7, %v374_v53  }
  0xab   :  { %394 = vst.msk [vmem:[#allocation0] ss:$8 sm:$0xf] %vm393_vm8, %v392_v48  }
  0xaf   :  { %v554_v57 = vpop.permute.xlu2 %553  }
  0xb0   :  { %v410_v55 = vpop.permute.xlu0 %409   ;;  %v428_v56 = vpop.permute.xlu1 %427  }
  0xb1   :  { %412 = vst.msk [vmem:[#allocation0] ss:$8 sm:$0xf] %vm411_vm9, %v410_v55  }
  0xb2   :  { %430 = vst.msk [vmem:[#allocation0] ss:$8 sm:$0xf] %vm429_vm10, %v428_v56  }
  0xb3   :  { %448 = vst.msk [vmem:[#allocation0] ss:$8 sm:$0xf] %vm447_vm11, %v446_v51  }
  0xb8   :  { %v464_v58 = vpop.permute.xlu0 %463   ;;  %v482_v59 = vpop.permute.xlu1 %481  }
  0xb9   :  { %466 = vst.msk [vmem:[#allocation0] ss:$8 sm:$0xf] %vm465_vm12, %v464_v58  }
  0xba   :  { %484 = vst.msk [vmem:[#allocation0] ss:$8 sm:$0xf] %vm483_vm13, %v482_v59  }
  0xbb   :  { %502 = vst.msk [vmem:[#allocation0] ss:$8 sm:$0xf] %vm501_vm14, %v500_v54  }
  0xc0   :  { %v518_v60 = vpop.permute.xlu0 %517   ;;  %v536_v61 = vpop.permute.xlu1 %535  }
  0xc1   :  { %520 = vst.msk [vmem:[#allocation0] ss:$8 sm:$0xf] %vm519_vm15, %v518_v60  }
  0xc2   :  { %538 = vst.msk [vmem:[#allocation0] ss:$8 sm:$0xf] %vm537_vm0, %v536_v61  }
  0xc3   :  { %556 = vst.msk [vmem:[#allocation0] ss:$8 sm:$0xf] %vm555_vm1, %v554_v57  }
  0xc8   :  { %v572_v62 = vpop.permute.xlu0 %571  }
  0xc9   :  { %574 = vst.msk [vmem:[#allocation0] ss:$8 sm:$0xf] %vm573_vm2, %v572_v62  }
  0xd0   :  { %v577_v63 = vld [vmem:[#allocation0] sm:$0x1]  ;;  %v582_v0 = vld [vmem:[#allocation0 + $0x8] sm:$0x1]  ;;  %v588_v1 = vld [vmem:[#allocation0 + $0x10] sm:$0x1] }
  0xd1   :  { %580 = vst [vmem:[%s1294_s1] sm:$0x1] %v577_v63  ;;  %v594_v2 = vld [vmem:[#allocation0 + $0x18] sm:$0x1] }
  0xd2   :  { %726 = vst [vmem:[%s1294_s1 + $0x1] sm:$0x1] %v582_v0 }
  0xd3   :  { %727 = vst [vmem:[%s1294_s1 + $0x2] sm:$0x1] %v588_v1 }
  0xd4   :  { %728 = vst [vmem:[%s1294_s1 + $0x3] sm:$0x1] %v594_v2 }

// kernel: clip_boxes.1
= control target key start
LH: loop header
LB: loop body
LE: loop exit
PB: predicated region body
PF: predicated region fallthrough
CT: control target
= control target key end

     0   :  { %s104_s0 = inlined_call_operand.vmem [shape: f32[8,512], index: 0, kind: input, shape index: {}, may-alias: {0,3}]   ;;  %s105_s1 = inlined_call_operand.vmem [shape: f32[1,512], index: 1, kind: input, shape index: {}]   ;;  %s106_s2 = inlined_call_operand.vmem [shape: f32[1,512], index: 2, kind: input, shape index: {}]   ;;  %s107_s3 = inlined_call_operand.vmem [shape: f32[8,512], index: 3, kind: output, shape index: {}, may-alias: {0,3}]  }
   0x1   :  { %v14_v0 = vld [vmem:[%s104_s0] sm:$0xff]  ;;  %v15_v5 = vld [vmem:[%s104_s0 + $0x8] sm:$0xff]  ;;  %v16_v8 = vld [vmem:[%s104_s0 + $0x10] sm:$0xff] }
   0x2   :  { %v18_v1 = vld [vmem:[%s105_s1] sm:$0xf]  ;;  %v17_v11 = vld [vmem:[%s104_s0 + $0x18] sm:$0xff] }
   0x3   :  { %v32_v2 = vld [vmem:[%s106_s2] sm:$0xf]  ;;  %v20_v3 = vperm.slane %v18_v1, 0  ;;  %v21_v6 = vperm.slane %v18_v1, 1  ;;  %v22_v9 = vperm.slane %v18_v1, 2  ;;  %v23_v12 = vperm.slane %v18_v1, 3 }
   0x4   :  { %v34_v4 = vperm.slane %v32_v2, 0  ;;  %v35_v7 = vperm.slane %v32_v2, 1  ;;  %v36_v10 = vperm.slane %v32_v2, 2  ;;  %v37_v13 = vperm.slane %v32_v2, 3 }
   0x5   :  { %v28_v14 = vmax.f32 %v14_v0, %v20_v3  ;;  %v29_v15 = vmax.f32 %v15_v5, %v21_v6  ;;  %v30_v16 = vmax.f32 %v16_v8, %v22_v9  ;;  %v31_v17 = vmax.f32 %v17_v11, %v23_v12 }
   0x7   :  { %v42_v18 = vmin.f32 %v28_v14, %v34_v4  ;;  %v43_v19 = vmin.f32 %v29_v15, %v35_v7  ;;  %v44_v20 = vmin.f32 %v30_v16, %v36_v10  ;;  %v45_v21 = vmin.f32 %v31_v17, %v37_v13 }
   0x9   :  { %46 = vst [vmem:[%s107_s3] sm:$0xff] %v42_v18 }
   0xa   :  { %47 = vst [vmem:[%s107_s3 + $0x8] sm:$0xff] %v43_v19 }
   0xb   :  { %48 = vst [vmem:[%s107_s3 + $0x10] sm:$0xff] %v44_v20 }
   0xc   :  { %49 = vst [vmem:[%s107_s3 + $0x18] sm:$0xff] %v45_v21 }

</bundles_post_ra>
